<compile_context>
chip_gen: v6e
topology: v6e:2x2x1
jax: 0.10.0
libtpu: 0.0.40
codegen_flags: <defaults>
</compile_context>

<pallas_src>
import functools
import math

import jax
import jax.numpy as jnp
from jax.experimental import pallas as pl
from jax.experimental.pallas import tpu as pltpu


def _round_up(x, m):
    return (x + m - 1) // m * m


def _aggregator_kernel(x_ref, wp_ref, bp_ref, wkv_ref, bkv_ref, qmat_ref,
                       wo_ref, bo_ref, onehot_ref, out_ref, *, e_pad):
    # Node projection: [N_pad, E_pad]
    proj = jnp.dot(x_ref[...], wp_ref[...],
                   preferred_element_type=jnp.float32) + bp_ref[...]

    # Fused K|V projection: [N_pad, 2*E_pad]
    kv = jnp.dot(proj, wkv_ref[...],
                 preferred_element_type=jnp.float32) + bkv_ref[...]
    k = kv[:, :e_pad]                                            # [N_pad, E_pad]
    v = kv[:, e_pad:]                                            # [N_pad, E_pad]

    # Per-head scores, replicated across each head's lanes: [N_pad, E_pad].
    # Qmat already carries the 1/sqrt(dh) scale and the head block structure.
    s = jnp.dot(k, qmat_ref[...], preferred_element_type=jnp.float32)

    # Numerically-stable exp (per-lane max over all nodes; cancels in the ratio).
    m = jnp.max(s, axis=0, keepdims=True)                        # [1, E_pad]
    e = jnp.exp(s - m)                                           # [N_pad, E_pad]

    onehot = onehot_ref[...]                                     # [G_pad, N_pad]

    # Segment sums over graphs as MXU matmuls.
    denom = jnp.dot(onehot, e, preferred_element_type=jnp.float32)       # [G_pad, E_pad]
    numer = jnp.dot(onehot, e * v, preferred_element_type=jnp.float32)   # [G_pad, E_pad]
    single = jnp.dot(onehot, proj, preferred_element_type=jnp.float32)   # [G_pad, E_pad]
    counts = jnp.sum(onehot, axis=1, keepdims=True)                      # [G_pad, 1]

    # Attention heads output (lane-concatenated), then output projection.
    o = numer * pl.reciprocal(denom + 1e-30, approx=True)        # [G_pad, E_pad]
    attn = jnp.dot(o, wo_ref[...],
                   preferred_element_type=jnp.float32) + bo_ref[...]     # [G_pad, E_pad]

    # count == 0 -> zeros ; count == 1 -> projected node ; count > 1 -> attention.
    is_single = (counts == 1.0).astype(jnp.float32)              # [G_pad, 1]
    is_multi = (counts > 1.0).astype(jnp.float32)                # [G_pad, 1]
    result = single * is_single + attn * is_multi                # [G_pad, E_pad]

    out_ref[...] = result.astype(out_ref.dtype)


def attention_graph_aggregator(node_states, graph_idx, n_graphs, params, num_heads):
    f32 = jnp.float32
    N, node_dim = node_states.shape
    E = params["wo"].shape[0]          # graph_dim
    dh = E // num_heads
    scale = 1.0 / math.sqrt(dh)

    # Lane-dense padded sizes.
    D_pad = _round_up(node_dim, 128)
    E_pad = _round_up(E, 128)
    N_pad = _round_up(N, 128)
    G_pad = _round_up(n_graphs, 8)

    # ---- weight / bias prep (zero-padded, pre-transposed) ----
    wp_t = jnp.zeros((D_pad, E_pad), f32).at[:node_dim, :E].set(params["wp"].T)
    bp = jnp.zeros((1, E_pad), f32).at[:, :E].set(params["bp"])

    wkv_t = (jnp.zeros((E_pad, 2 * E_pad), f32)
             .at[:E, :E].set(params["wk"].T)
             .at[:E, E_pad:E_pad + E].set(params["wv"].T))
    bkv = (jnp.zeros((1, 2 * E_pad), f32)
           .at[:, :E].set(params["bk"])
           .at[:, E_pad:E_pad + E].set(params["bv"]))

    wo_t = jnp.zeros((E_pad, E_pad), f32).at[:E, :E].set(params["wo"].T)
    bo = jnp.zeros((1, E_pad), f32).at[:, :E].set(params["bo"])

    # Projected query folded into a block-diagonal (per-head) scaled matrix:
    # Qmat[i, j] = q_proj[i] * scale  iff head(i) == head(j), else 0.
    q_proj = params["graph_query"] @ params["wq"].T + params["bq"][None, :]   # [1, E]
    head_id = jnp.arange(E) // dh
    same_head = (head_id[:, None] == head_id[None, :]).astype(f32)            # [E, E]
    qmat = jnp.zeros((E_pad, E_pad), f32).at[:E, :E].set(
        same_head * (q_proj[0][:, None] * scale))

    # ---- node states: pad rows by replicating node 0 (never selected by one-hot) ----
    x = node_states.astype(f32)
    x_pad = jnp.zeros((N_pad, D_pad), f32).at[:N, :node_dim].set(x)
    if N_pad > N:
        x_pad = x_pad.at[N:, :node_dim].set(
            jnp.broadcast_to(x[0:1], (N_pad - N, node_dim)))

    # ---- one-hot segment matrix [G_pad, N_pad]; padded nodes get graph id -1 ----
    gidx_pad = jnp.full((N_pad,), -1, jnp.int32).at[:N].set(graph_idx.astype(jnp.int32))
    onehot_t = (jnp.arange(G_pad, dtype=jnp.int32)[:, None]
                == gidx_pad[None, :]).astype(f32)

    kernel = functools.partial(_aggregator_kernel, e_pad=E_pad)

    def full_spec(shape):
        return pl.BlockSpec(shape, lambda i: (0,) * len(shape))

    inputs = (x_pad, wp_t, bp, wkv_t, bkv, qmat, wo_t, bo, onehot_t)
    out = pl.pallas_call(
        kernel,
        out_shape=jax.ShapeDtypeStruct((G_pad, E_pad), f32),
        grid=(1,),
        in_specs=[full_spec(a.shape) for a in inputs],
        out_specs=full_spec((G_pad, E_pad)),
    )(*inputs)

    return out[:n_graphs, :E]


def reference(node_states, graph_idx, n_graphs, params, num_heads):
    """Pure-JAX reference following the PyTorch forward exactly."""
    proj = node_states @ params["wp"].T + params["bp"]
    E = params["wo"].shape[0]
    dh = E // num_heads
    q = params["graph_query"] @ params["wq"].T + params["bq"][None, :]   # [1, E]
    outs = []
    for i in range(n_graphs):
        m = graph_idx == i
        cnt = int(m.sum())
        if cnt == 0:
            outs.append(jnp.zeros((E,), jnp.float32))
        elif cnt == 1:
            outs.append(proj[m][0])
        else:
            nodes = proj[m]
            K = nodes @ params["wk"].T + params["bk"]
            V = nodes @ params["wv"].T + params["bv"]
            heads = []
            for h in range(num_heads):
                qh = q[0, h * dh:(h + 1) * dh]
                Kh = K[:, h * dh:(h + 1) * dh]
                Vh = V[:, h * dh:(h + 1) * dh]
                p = jax.nn.softmax((Kh @ qh) / math.sqrt(dh))
                heads.append(p @ Vh)
            concat = jnp.concatenate(heads)
            outs.append(concat @ params["wo"].T + params["bo"])
    return jnp.stack(outs)


if __name__ == "__main__":
    node_dim, graph_dim, num_heads = 16, 32, 8
    N, n_graphs = 16, 4

    key = jax.random.PRNGKey(0)
    ks = jax.random.split(key, 12)

    # Deterministic synthetic parameters (PyTorch [out, in] convention).
    params = {
        "wp": 0.1 * jax.random.normal(ks[0], (graph_dim, node_dim), jnp.float32),
        "bp": 0.1 * jax.random.normal(ks[1], (graph_dim,), jnp.float32),
        "wq": 0.1 * jax.random.normal(ks[2], (graph_dim, graph_dim), jnp.float32),
        "bq": 0.1 * jax.random.normal(ks[3], (graph_dim,), jnp.float32),
        "wk": 0.1 * jax.random.normal(ks[4], (graph_dim, graph_dim), jnp.float32),
        "bk": 0.1 * jax.random.normal(ks[5], (graph_dim,), jnp.float32),
        "wv": 0.1 * jax.random.normal(ks[6], (graph_dim, graph_dim), jnp.float32),
        "bv": 0.1 * jax.random.normal(ks[7], (graph_dim,), jnp.float32),
        "wo": 0.1 * jax.random.normal(ks[8], (graph_dim, graph_dim), jnp.float32),
        "bo": 0.1 * jax.random.normal(ks[9], (graph_dim,), jnp.float32),
        "graph_query": jax.random.normal(ks[10], (1, graph_dim), jnp.float32),
    }

    node_states = jax.random.normal(ks[11], (N, node_dim), jnp.float32)
    # graph 0: 8 nodes, graph 1: 7 nodes, graph 2: 1 node (single-node path),
    # graph 3: 0 nodes (empty-graph path).
    graph_idx = jnp.array([0] * 8 + [1] * 7 + [2] * 1, dtype=jnp.int32)

    out = attention_graph_aggregator(node_states, graph_idx, n_graphs, params, num_heads)
    out = jax.block_until_ready(out)

    ref = reference(node_states, graph_idx, n_graphs, params, num_heads)
    assert out.shape == (n_graphs, graph_dim)
    assert jnp.allclose(out, ref, atol=5e-2, rtol=5e-2), (
        f"max abs err = {jnp.max(jnp.abs(out - ref))}")

    print("KERNEL_OK")
</pallas_src>

<mosaic_0001>
module attributes {stable_mosaic.version = 11 : i64} {
  func.func @_aggregator_kernel(%arg0: i32, %arg1: memref<128x128xf32, #tpu.memory_space<vmem>>, %arg2: memref<128x128xf32, #tpu.memory_space<vmem>>, %arg3: memref<1x128xf32, #tpu.memory_space<vmem>>, %arg4: memref<128x256xf32, #tpu.memory_space<vmem>>, %arg5: memref<1x256xf32, #tpu.memory_space<vmem>>, %arg6: memref<128x128xf32, #tpu.memory_space<vmem>>, %arg7: memref<128x128xf32, #tpu.memory_space<vmem>>, %arg8: memref<1x128xf32, #tpu.memory_space<vmem>>, %arg9: memref<8x128xf32, #tpu.memory_space<vmem>>, %arg10: memref<8x128xf32, #tpu.memory_space<vmem>>) attributes {dimension_semantics = [#tpu.dimension_semantics<arbitrary>], iteration_bounds = array<i64: 1>, scalar_prefetch = 0 : i64, scratch_operands = 0 : i64, tpu.core_type = #tpu.core_type<tc>, window_params = [{pipeline_mode = #tpu.pipeline_mode<synchronous>, transform_indices = @transform_0, window_bounds = array<i64: 128, 128>}, {pipeline_mode = #tpu.pipeline_mode<synchronous>, transform_indices = @transform_1, window_bounds = array<i64: 128, 128>}, {pipeline_mode = #tpu.pipeline_mode<synchronous>, transform_indices = @transform_2, window_bounds = array<i64: 1, 128>}, {pipeline_mode = #tpu.pipeline_mode<synchronous>, transform_indices = @transform_3, window_bounds = array<i64: 128, 256>}, {pipeline_mode = #tpu.pipeline_mode<synchronous>, transform_indices = @transform_4, window_bounds = array<i64: 1, 256>}, {pipeline_mode = #tpu.pipeline_mode<synchronous>, transform_indices = @transform_5, window_bounds = array<i64: 128, 128>}, {pipeline_mode = #tpu.pipeline_mode<synchronous>, transform_indices = @transform_6, window_bounds = array<i64: 128, 128>}, {pipeline_mode = #tpu.pipeline_mode<synchronous>, transform_indices = @transform_7, window_bounds = array<i64: 1, 128>}, {pipeline_mode = #tpu.pipeline_mode<synchronous>, transform_indices = @transform_8, window_bounds = array<i64: 8, 128>}, {pipeline_mode = #tpu.pipeline_mode<synchronous>, transform_indices = @transform_9, window_bounds = array<i64: 8, 128>}]} {
    %c0 = arith.constant 0 : index
    %c0_0 = arith.constant 0 : index
    %0 = vector.load %arg1[%c0, %c0_0] : memref<128x128xf32, #tpu.memory_space<vmem>>, vector<128x128xf32>
    %c0_1 = arith.constant 0 : index
    %c0_2 = arith.constant 0 : index
    %1 = vector.load %arg2[%c0_1, %c0_2] : memref<128x128xf32, #tpu.memory_space<vmem>>, vector<128x128xf32>
    %cst = arith.constant dense<0.000000e+00> : vector<128x128xf32>
    %2 = tpu.matmul %0, %1, %cst {dimension_numbers = #tpu.dot_dimension_numbers<[1], [0], [0], [1], [0, 0, 1, 1], [], []>} : vector<128x128xf32>, vector<128x128xf32>, vector<128x128xf32> -> vector<128x128xf32>
    %c0_3 = arith.constant 0 : index
    %c0_4 = arith.constant 0 : index
    %3 = vector.load %arg3[%c0_3, %c0_4] : memref<1x128xf32, #tpu.memory_space<vmem>>, vector<1x128xf32>
    %4 = vector.broadcast %3 : vector<1x128xf32> to vector<128x128xf32>
    %5 = arith.addf %2, %4 : vector<128x128xf32>
    %c0_5 = arith.constant 0 : index
    %c0_6 = arith.constant 0 : index
    %6 = vector.load %arg4[%c0_5, %c0_6] : memref<128x256xf32, #tpu.memory_space<vmem>>, vector<128x256xf32>
    %cst_7 = arith.constant dense<0.000000e+00> : vector<128x256xf32>
    %7 = tpu.matmul %5, %6, %cst_7 {dimension_numbers = #tpu.dot_dimension_numbers<[1], [0], [0], [1], [0, 0, 1, 1], [], []>} : vector<128x128xf32>, vector<128x256xf32>, vector<128x256xf32> -> vector<128x256xf32>
    %c0_8 = arith.constant 0 : index
    %c0_9 = arith.constant 0 : index
    %8 = vector.load %arg5[%c0_8, %c0_9] : memref<1x256xf32, #tpu.memory_space<vmem>>, vector<1x256xf32>
    %9 = vector.broadcast %8 : vector<1x256xf32> to vector<128x256xf32>
    %10 = arith.addf %7, %9 : vector<128x256xf32>
    %11 = vector.extract_strided_slice %10 {offsets = [0, 0], sizes = [128, 128], strides = [1, 1]} : vector<128x256xf32> to vector<128x128xf32>
    %12 = vector.extract_strided_slice %10 {offsets = [0, 128], sizes = [128, 128], strides = [1, 1]} : vector<128x256xf32> to vector<128x128xf32>
    %c0_10 = arith.constant 0 : index
    %c0_11 = arith.constant 0 : index
    %13 = vector.load %arg6[%c0_10, %c0_11] : memref<128x128xf32, #tpu.memory_space<vmem>>, vector<128x128xf32>
    %cst_12 = arith.constant dense<0.000000e+00> : vector<128x128xf32>
    %14 = tpu.matmul %11, %13, %cst_12 {dimension_numbers = #tpu.dot_dimension_numbers<[1], [0], [0], [1], [0, 0, 1, 1], [], []>} : vector<128x128xf32>, vector<128x128xf32>, vector<128x128xf32> -> vector<128x128xf32>
    %cst_13 = arith.constant dense<0xFF800000> : vector<128xf32>
    %15 = vector.multi_reduction <maximumf>, %14, %cst_13 [0] : vector<128x128xf32> to vector<128xf32>
    %16 = vector.shape_cast %15 : vector<128xf32> to vector<1x128xf32>
    %17 = vector.broadcast %16 : vector<1x128xf32> to vector<128x128xf32>
    %18 = arith.subf %14, %17 : vector<128x128xf32>
    %19 = math.exp %18 : vector<128x128xf32>
    %c0_14 = arith.constant 0 : index
    %c0_15 = arith.constant 0 : index
    %20 = vector.load %arg9[%c0_14, %c0_15] : memref<8x128xf32, #tpu.memory_space<vmem>>, vector<8x128xf32>
    %cst_16 = arith.constant dense<0.000000e+00> : vector<8x128xf32>
    %21 = tpu.matmul %20, %19, %cst_16 {dimension_numbers = #tpu.dot_dimension_numbers<[1], [0], [0], [1], [0, 0, 1, 1], [], []>} : vector<8x128xf32>, vector<128x128xf32>, vector<8x128xf32> -> vector<8x128xf32>
    %22 = arith.mulf %19, %12 : vector<128x128xf32>
    %cst_17 = arith.constant dense<0.000000e+00> : vector<8x128xf32>
    %23 = tpu.matmul %20, %22, %cst_17 {dimension_numbers = #tpu.dot_dimension_numbers<[1], [0], [0], [1], [0, 0, 1, 1], [], []>} : vector<8x128xf32>, vector<128x128xf32>, vector<8x128xf32> -> vector<8x128xf32>
    %cst_18 = arith.constant dense<0.000000e+00> : vector<8x128xf32>
    %24 = tpu.matmul %20, %5, %cst_18 {dimension_numbers = #tpu.dot_dimension_numbers<[1], [0], [0], [1], [0, 0, 1, 1], [], []>} : vector<8x128xf32>, vector<128x128xf32>, vector<8x128xf32> -> vector<8x128xf32>
    %cst_19 = arith.constant dense<0.000000e+00> : vector<8xf32>
    %25 = vector.multi_reduction <add>, %20, %cst_19 [1] : vector<8x128xf32> to vector<8xf32>
    %26 = vector.shape_cast %25 : vector<8xf32> to vector<8x1xf32>
    %cst_20 = arith.constant 1.000000e-30 : f32
    %27 = vector.broadcast %cst_20 : f32 to vector<8x128xf32>
    %28 = arith.addf %21, %27 : vector<8x128xf32>
    %29 = tpu.reciprocal %28 {approx = true} : vector<8x128xf32> -> vector<8x128xf32>
    %30 = arith.mulf %23, %29 : vector<8x128xf32>
    %c0_21 = arith.constant 0 : index
    %c0_22 = arith.constant 0 : index
    %31 = vector.load %arg7[%c0_21, %c0_22] : memref<128x128xf32, #tpu.memory_space<vmem>>, vector<128x128xf32>
    %cst_23 = arith.constant dense<0.000000e+00> : vector<8x128xf32>
    %32 = tpu.matmul %30, %31, %cst_23 {dimension_numbers = #tpu.dot_dimension_numbers<[1], [0], [0], [1], [0, 0, 1, 1], [], []>} : vector<8x128xf32>, vector<128x128xf32>, vector<8x128xf32> -> vector<8x128xf32>
    %c0_24 = arith.constant 0 : index
    %c0_25 = arith.constant 0 : index
    %33 = vector.load %arg8[%c0_24, %c0_25] : memref<1x128xf32, #tpu.memory_space<vmem>>, vector<1x128xf32>
    %34 = vector.broadcast %33 : vector<1x128xf32> to vector<8x128xf32>
    %35 = arith.addf %32, %34 : vector<8x128xf32>
    %cst_26 = arith.constant 1.000000e+00 : f32
    %36 = vector.broadcast %cst_26 : f32 to vector<8x1xf32>
    %37 = arith.cmpf oeq, %26, %36 : vector<8x1xf32>
    %38 = arith.extui %37 : vector<8x1xi1> to vector<8x1xi32>
    %39 = arith.sitofp %38 : vector<8x1xi32> to vector<8x1xf32>
    %cst_27 = arith.constant 1.000000e+00 : f32
    %40 = vector.broadcast %cst_27 : f32 to vector<8x1xf32>
    %41 = arith.cmpf ogt, %26, %40 : vector<8x1xf32>
    %42 = arith.extui %41 : vector<8x1xi1> to vector<8x1xi32>
    %43 = arith.sitofp %42 : vector<8x1xi32> to vector<8x1xf32>
    %44 = vector.broadcast %39 : vector<8x1xf32> to vector<8x128xf32>
    %45 = arith.mulf %24, %44 : vector<8x128xf32>
    %46 = vector.broadcast %43 : vector<8x1xf32> to vector<8x128xf32>
    %47 = arith.mulf %35, %46 : vector<8x128xf32>
    %48 = arith.addf %45, %47 : vector<8x128xf32>
    %c0_28 = arith.constant 0 : index
    %c0_29 = arith.constant 0 : index
    %49 = vector.load %arg10[%c0_28, %c0_29] : memref<8x128xf32, #tpu.memory_space<vmem>>, vector<8x128xf32>
    tpu.vector_store %arg10[%c0_28, %c0_29], %48 {strides = array<i32>} : memref<8x128xf32, #tpu.memory_space<vmem>>, vector<8x128xf32>,
    return
  }
  func.func @transform_0(%arg0: i32) -> (i32, i32) {
    %c0_i32 = arith.constant 0 : i32
    %c0_i32_0 = arith.constant 0 : i32
    %c0_i32_1 = arith.constant 0 : i32
    return %c0_i32, %c0_i32_0 : i32, i32
  }
  func.func @transform_1(%arg0: i32) -> (i32, i32) {
    %c0_i32 = arith.constant 0 : i32
    %c0_i32_0 = arith.constant 0 : i32
    %c0_i32_1 = arith.constant 0 : i32
    return %c0_i32, %c0_i32_0 : i32, i32
  }
  func.func @transform_2(%arg0: i32) -> (i32, i32) {
    %c0_i32 = arith.constant 0 : i32
    %c0_i32_0 = arith.constant 0 : i32
    %c0_i32_1 = arith.constant 0 : i32
    return %c0_i32, %c0_i32_0 : i32, i32
  }
  func.func @transform_3(%arg0: i32) -> (i32, i32) {
    %c0_i32 = arith.constant 0 : i32
    %c0_i32_0 = arith.constant 0 : i32
    %c0_i32_1 = arith.constant 0 : i32
    return %c0_i32, %c0_i32_0 : i32, i32
  }
  func.func @transform_4(%arg0: i32) -> (i32, i32) {
    %c0_i32 = arith.constant 0 : i32
    %c0_i32_0 = arith.constant 0 : i32
    %c0_i32_1 = arith.constant 0 : i32
    return %c0_i32, %c0_i32_0 : i32, i32
  }
  func.func @transform_5(%arg0: i32) -> (i32, i32) {
    %c0_i32 = arith.constant 0 : i32
    %c0_i32_0 = arith.constant 0 : i32
    %c0_i32_1 = arith.constant 0 : i32
    return %c0_i32, %c0_i32_0 : i32, i32
  }
  func.func @transform_6(%arg0: i32) -> (i32, i32) {
    %c0_i32 = arith.constant 0 : i32
    %c0_i32_0 = arith.constant 0 : i32
    %c0_i32_1 = arith.constant 0 : i32
    return %c0_i32, %c0_i32_0 : i32, i32
  }
  func.func @transform_7(%arg0: i32) -> (i32, i32) {
    %c0_i32 = arith.constant 0 : i32
    %c0_i32_0 = arith.constant 0 : i32
    %c0_i32_1 = arith.constant 0 : i32
    return %c0_i32, %c0_i32_0 : i32, i32
  }
  func.func @transform_8(%arg0: i32) -> (i32, i32) {
    %c0_i32 = arith.constant 0 : i32
    %c0_i32_0 = arith.constant 0 : i32
    %c0_i32_1 = arith.constant 0 : i32
    return %c0_i32, %c0_i32_0 : i32, i32
  }
  func.func @transform_9(%arg0: i32) -> (i32, i32) {
    %c0_i32 = arith.constant 0 : i32
    %c0_i32_0 = arith.constant 0 : i32
    %c0_i32_1 = arith.constant 0 : i32
    return %c0_i32, %c0_i32_0 : i32, i32
  }
}

</mosaic_0001>

<bundles_post_ra>
// kernel: tpu_custom_call.1
= control target key start
LH: loop header
LB: loop body
LE: loop exit
PB: predicated region body
PF: predicated region fallthrough
CT: control target
= control target key end

     0   :  { %14 = vsyncpa [#allocation3], 0  ;;  %s2002_s0 = inlined_call_operand.hbm [shape: f32[128,128], index: 0, kind: input, shape index: {}]   ;;  %s2003_s1 = inlined_call_operand.hbm [shape: f32[128,128], index: 1, kind: input, shape index: {}]   ;;  %s2004_s2 = inlined_call_operand.vmem [shape: f32[1,128], index: 2, kind: input, shape index: {}]   ;;  %s2005_s3 = inlined_call_operand.hbm [shape: f32[128,256], index: 3, kind: input, shape index: {}]   ;;  %s2006_s4 = inlined_call_operand.vmem [shape: f32[1,256], index: 4, kind: input, shape index: {}]   ;;  %s2007_s5 = inlined_call_operand.hbm [shape: f32[128,128], index: 5, kind: input, shape index: {}]   ;;  %s2008_s6 = inlined_call_operand.hbm [shape: f32[128,128], index: 6, kind: input, shape index: {}]   ;;  %s2009_s7 = inlined_call_operand.vmem [shape: f32[1,128], index: 7, kind: input, shape index: {}]   ;;  %s2010_s8 = inlined_call_operand.vmem [shape: f32[8,128], index: 8, kind: input, shape index: {}]   ;;  %s2011_s9 = inlined_call_operand.hbm [shape: f32[8,128], index: 9, kind: output, shape index: {}]  }
   0x1   :  { %15 = vsyncpa [#allocation6], 0 }
   0x2   :  { %16 = vsyncpa [#allocation9], 0 }
   0x3   :  { %17 = vsyncpa [#allocation4], 0  ;;  %s1633_s30 = smov [#allocation5]   ;;  %s1634_s11 = smov [#allocation8]  }
   0x4   :  { %s35_s10 = sshll.u32 %s1633_s30, 4  ;;  %s63_s12 = sshll.u32 %s1634_s11, 4  ;;  %s36_s10 = int_to_ptr.vmem [resolvable:$true] %s35_s10  ;;  %s64_s12 = int_to_ptr.vmem [resolvable:$true] %s63_s12 }
   0x5   :  { %s1513_s13 = scalar_lea.vmem %s36_s10, 2048  ;;  %p1518_p1 = scmp.lt.s32.totalorder %s36_s10, %s36_s10 }
   0x6   :  { %p1514_p0 = scmp.ne.s32.totalorder %s36_s10, %s1513_s13  ;;  %p1519_p2 = scmp.lt.s32.totalorder %s1513_s13, %s1513_s13 }
   0x8   :  { %p1520_p3 = por %p1519_p2, %p1518_p1 }
   0xa   :  { %p1521_p4 = pnand %p1520_p3, %p1514_p0 }
   0xc   :  { %1524 = shalt.err (!%p1521_p4)
}
   0xd   :  { %s1635_s14 = smov 128   ;;  %s1636_s15 = smov 8  }
   0xe   :  { %41 = dma.hbm_to_vmem [thread:$0]  %s2003_s1, 2048, %s36_s10, [#allocation6], %s1635_s14, %s1635_s14, %s1636_s15  }
   0xf   :  { %s1533_s18 = scalar_lea.vmem %s64_s12, 2048  ;;  %p1538_p6 = scmp.lt.s32.totalorder %s64_s12, %s64_s12 }
  0x10   :  { %p1534_p5 = scmp.ne.s32.totalorder %s64_s12, %s1533_s18  ;;  %p1539_p7 = scmp.lt.s32.totalorder %s1533_s18, %s1533_s18 }
  0x12   :  { %p1540_p8 = por %p1539_p7, %p1538_p6 }
  0x14   :  { %p1541_p9 = pnand %p1540_p8, %p1534_p5 }
  0x16   :  { %1544 = shalt.err (!%p1541_p9)
}
  0x17   :  { %69 = dma.hbm_to_vmem [thread:$0]  %s2007_s5, 2048, %s64_s12, [#allocation9], %s1635_s14, %s1635_s14, %s1636_s15  }
  0x18   :  { %s1637_s21 = smov [#allocation2]   ;;  %s1638_s23 = smov [#allocation7]  }
  0x19   :  { %s23_s22 = sshll.u32 %s1637_s21, 4  ;;  %s49_s24 = sshll.u32 %s1638_s23, 4  ;;  %s24_s22 = int_to_ptr.vmem [resolvable:$true] %s23_s22  ;;  %s50_s24 = int_to_ptr.vmem [resolvable:$true] %s49_s24 }
  0x1a   :  { %s1553_s1 = scalar_lea.vmem %s24_s22, 2048  ;;  %p1558_p11 = scmp.lt.s32.totalorder %s24_s22, %s24_s22 }
  0x1b   :  { %p1554_p10 = scmp.ne.s32.totalorder %s24_s22, %s1553_s1  ;;  %p1559_p12 = scmp.lt.s32.totalorder %s1553_s1, %s1553_s1 }
  0x1d   :  { %p1560_p13 = por %p1559_p12, %p1558_p11 }
  0x1f   :  { %p1561_p0 = pnand %p1560_p13, %p1554_p10 }
  0x21   :  { %1564 = shalt.err (!%p1561_p0)
}
  0x22   :  { %29 = dma.hbm_to_vmem [thread:$0]  %s2002_s0, 2048, %s24_s22, [#allocation3], %s1635_s14, %s1635_s14, %s1636_s15  }
  0x23   :  { %s1573_s5 = scalar_lea.vmem %s50_s24, 4096  ;;  %p1578_p2 = scmp.lt.s32.totalorder %s50_s24, %s50_s24 }
  0x24   :  { %p1574_p1 = scmp.ne.s32.totalorder %s50_s24, %s1573_s5  ;;  %p1579_p3 = scmp.lt.s32.totalorder %s1573_s5, %s1573_s5 }
  0x26   :  { %p1580_p4 = por %p1579_p3, %p1578_p2 }
  0x28   :  { %p1581_p5 = pnand %p1580_p4, %p1574_p1 }
  0x2a   :  { %1584 = shalt.err (!%p1581_p5)
}
  0x2b   :  { %s1639_s27 = smov 256   ;;  %s1640_s28 = smov 16  }
  0x2c   :  { %55 = dma.hbm_to_vmem [thread:$0]  %s2005_s3, 4096, %s50_s24, [#allocation6], %s1639_s27, %s1639_s27, %s1640_s28  }
  0x2d   :  { %s1641_s10 = smov [#allocation10]  }
  0x2e   :  { %s75_s11 = sshll.u32 %s1641_s10, 4  ;;  %s76_s11 = int_to_ptr.vmem [resolvable:$true] %s75_s11 }
  0x2f   :  { %s1593_s12 = scalar_lea.vmem %s76_s11, 2048  ;;  %p1598_p7 = scmp.lt.s32.totalorder %s76_s11, %s76_s11 }
  0x30   :  { %p1594_p6 = scmp.ne.s32.totalorder %s76_s11, %s1593_s12  ;;  %p1599_p8 = scmp.lt.s32.totalorder %s1593_s12, %s1593_s12 }
  0x32   :  { %p1600_p9 = por %p1599_p8, %p1598_p7 }
  0x34   :  { %p1601_p10 = pnand %p1600_p9, %p1594_p6 }
  0x36   :  { %1604 = shalt.err (!%p1601_p10)
}
  0x37   :  { %81 = dma.hbm_to_vmem [thread:$0]  %s2008_s6, 2048, %s76_s11, [#allocation9], %s1635_s14, %s1635_s14, %s1636_s15  }
  0x38   :  { %1625 = dma.done.wait [#allocation3], 2048  }
  0x39   :  { %1626 = vsyncadd [#allocation3], 4294965248 }
  0x3a   :  { %1627 = dma.done.wait [#allocation6], 6144  }
  0x3b   :  { %1628 = vsyncadd [#allocation6], 4294961152 }
  0x3c   :  { %1629 = dma.done.wait [#allocation9], 4096  }
  0x3d   :  { %1630 = vsyncadd [#allocation9], 4294963200  ;;  %v132_v0 = vld [vmem:[#allocation5 + $0x78] sm:$0xff]  ;;  %v131_v1 = vld [vmem:[#allocation5 + $0x70] sm:$0xff]  ;;  %vm1643_vm0 = vmmov 0   ;;  %s1644_s17 = smov [#allocation11]  }
  0x3e   :  { %1207 = vmatprep.subr.mxu0 %v132_v0  ;;  %v130_v2 = vld [vmem:[#allocation5 + $0x68] sm:$0xff]  ;;  %v129_v3 = vld [vmem:[#allocation5 + $0x60] sm:$0xff]  ;;  %v128_v5 = vld [vmem:[#allocation5 + $0x58] sm:$0xff]  ;;  %s1060_s18 = sshll.u32 %s1644_s17, 4  ;;  %s1061_s18 = int_to_ptr.vmem [resolvable:$true] %s1060_s18 }
  0x3f   :  { %1208 = vmatpush3.msra.mxu0 %v132_v0  ;;  %v101_v4 = vld [vmem:[#allocation2] sm:$0xff]  ;;  %v127_v6 = vld [vmem:[#allocation5 + $0x50] sm:$0xff]  ;;  %v126_v7 = vld [vmem:[#allocation5 + $0x48] sm:$0xff]  ;;  %v1642_v0 = vmov 0.0   ;;  %s1605_s19 = scalar_lea.vmem %s1061_s18, 128  ;;  %p1610_p12 = scmp.lt.s32.totalorder %s1061_s18, %s1061_s18 }
  0x40   :  { %1209 = vmatprep.subr.mxu0 %v131_v1  ;;  %1239 = vmatprep.mubr.f32.mxu0 %v101_v4  ;;  %v316_v8 = vld [vmem:[#allocation7 + $0xf8] sm:$0xff]  ;;  %v315_v9 = vld [vmem:[#allocation7 + $0xf0] sm:$0xff]  ;;  %v314_v10 = vld [vmem:[#allocation7 + $0xe8] sm:$0xff]  ;;  %p1606_p11 = scmp.ne.s32.totalorder %s1061_s18, %s1605_s19  ;;  %p1611_p13 = scmp.lt.s32.totalorder %s1605_s19, %s1605_s19 }
  0x41   :  { %1210 = vmatpush3.msra.mxu0 %v131_v1  ;;  %329 = vmatprep.subr.mxu1 %v316_v8  ;;  %v313_v11 = vld [vmem:[#allocation7 + $0xe0] sm:$0xff]  ;;  %v312_v13 = vld [vmem:[#allocation7 + $0xd8] sm:$0xff]  ;;  %v311_v14 = vld [vmem:[#allocation7 + $0xd0] sm:$0xff] }
  0x42   :  { %1211 = vmatprep.subr.mxu0 %v130_v2  ;;  %v125_v12 = vld [vmem:[#allocation5 + $0x40] sm:$0xff]  ;;  %330 = vmatpush1.msra.mxu1 %v315_v9  ;;  %v124_v15 = vld [vmem:[#allocation5 + $0x38] sm:$0xff]  ;;  %v310_v16 = vld [vmem:[#allocation7 + $0xc8] sm:$0xff]  ;;  %p1612_p0 = por %p1611_p13, %p1610_p12 }
  0x43   :  { %1212 = vmatpush3.msra.mxu0 %v130_v2  ;;  %331 = vmatprep.subr.mxu1 %v314_v10  ;;  %v309_v17 = vld [vmem:[#allocation7 + $0xc0] sm:$0xff]  ;;  %v123_v18 = vld [vmem:[#allocation5 + $0x30] sm:$0xff]  ;;  %v308_v19 = vld [vmem:[#allocation7 + $0xb8] sm:$0xff] }
  0x44   :  { %1213 = vmatprep.subr.mxu0 %v129_v3  ;;  %332 = vmatpush1.msra.mxu1 %v313_v11  ;;  %v307_v20 = vld [vmem:[#allocation7 + $0xb0] sm:$0xff]  ;;  %v122_v21 = vld [vmem:[#allocation5 + $0x28] sm:$0xff]  ;;  %v305_v23 = vld [vmem:[#allocation7 + $0xa0] sm:$0xff]  ;;  %p1613_p1 = pnand %p1612_p0, %p1606_p11 }
  0x45   :  { %1214 = vmatpush3.msra.mxu0 %v129_v3  ;;  %333 = vmatprep.subr.mxu1 %v312_v13  ;;  %v306_v22 = vld [vmem:[#allocation7 + $0xa8] sm:$0xff]  ;;  %v121_v24 = vld [vmem:[#allocation5 + $0x20] sm:$0xff]  ;;  %v304_v25 = vld [vmem:[#allocation7 + $0x98] sm:$0xff] }
  0x46   :  { %1215 = vmatprep.subr.mxu0 %v128_v5  ;;  %334 = vmatpush1.msra.mxu1 %v311_v14  ;;  %v303_v26 = vld [vmem:[#allocation7 + $0x90] sm:$0xff]  ;;  %v120_v27 = vld [vmem:[#allocation5 + $0x18] sm:$0xff]  ;;  %v302_v28 = vld [vmem:[#allocation7 + $0x88] sm:$0xff] }
  0x47   :  { %1216 = vmatpush3.msra.mxu0 %v128_v5  ;;  %335 = vmatprep.subr.mxu1 %v310_v16  ;;  %v301_v29 = vld [vmem:[#allocation7 + $0x80] sm:$0xff]  ;;  %v119_v30 = vld [vmem:[#allocation5 + $0x10] sm:$0xff]  ;;  %v300_v31 = vld [vmem:[#allocation7 + $0x78] sm:$0xff] }
  0x48   :  { %1217 = vmatprep.subr.mxu0 %v127_v6  ;;  %336 = vmatpush1.msra.mxu1 %v309_v17  ;;  %v299_v32 = vld [vmem:[#allocation7 + $0x70] sm:$0xff]  ;;  %v118_v33 = vld [vmem:[#allocation5 + $0x8] sm:$0xff]  ;;  %v297_v35 = vld [vmem:[#allocation7 + $0x60] sm:$0xff] }
  0x49   :  { %1218 = vmatpush3.msra.mxu0 %v127_v6  ;;  %337 = vmatprep.subr.mxu1 %v308_v19  ;;  %v298_v34 = vld [vmem:[#allocation7 + $0x68] sm:$0xff]  ;;  %v117_v36 = vld [vmem:[#allocation5] sm:$0xff]  ;;  %v296_v37 = vld [vmem:[#allocation7 + $0x58] sm:$0xff] }
  0x4a   :  { %1219 = vmatprep.subr.mxu0 %v126_v7  ;;  %338 = vmatpush1.msra.mxu1 %v307_v20  ;;  %v295_v38 = vld [vmem:[#allocation7 + $0x50] sm:$0xff]  ;;  %v102_v39 = vld [vmem:[#allocation2 + $0x8] sm:$0xff]  ;;  %v293_v42 = vld [vmem:[#allocation7 + $0x40] sm:$0xff] }
  0x4b   :  { %1220 = vmatpush3.msra.mxu0 %v126_v7  ;;  %339 = vmatprep.subr.mxu1 %v306_v22  ;;  %v294_v40 = vld [vmem:[#allocation7 + $0x48] sm:$0xff]  ;;  %v103_v41 = vld [vmem:[#allocation2 + $0x10] sm:$0xff]  ;;  %v292_v43 = vld [vmem:[#allocation7 + $0x38] sm:$0xff] }
  0x4c   :  { %1221 = vmatprep.subr.mxu0 %v125_v12  ;;  %340 = vmatpush1.msra.mxu1 %v305_v23  ;;  %v291_v44 = vld [vmem:[#allocation7 + $0x30] sm:$0xff]  ;;  %v104_v45 = vld [vmem:[#allocation2 + $0x18] sm:$0xff]  ;;  %v290_v46 = vld [vmem:[#allocation7 + $0x28] sm:$0xff] }
  0x4d   :  { %1222 = vmatpush3.msra.mxu0 %v125_v12  ;;  %341 = vmatprep.subr.mxu1 %v304_v25  ;;  %v105_v47 = vld [vmem:[#allocation2 + $0x20] sm:$0xff]  ;;  %v106_v48 = vld [vmem:[#allocation2 + $0x28] sm:$0xff]  ;;  %v107_v49 = vld [vmem:[#allocation2 + $0x30] sm:$0xff] }
  0x4e   :  { %1223 = vmatprep.subr.mxu0 %v124_v15  ;;  %342 = vmatpush1.msra.mxu1 %v303_v26  ;;  %v108_v50 = vld [vmem:[#allocation2 + $0x38] sm:$0xff]  ;;  %v109_v51 = vld [vmem:[#allocation2 + $0x40] sm:$0xff]  ;;  %v110_v52 = vld [vmem:[#allocation2 + $0x48] sm:$0xff] }
  0x4f   :  { %1224 = vmatpush3.msra.mxu0 %v124_v15  ;;  %343 = vmatprep.subr.mxu1 %v302_v28  ;;  %v111_v53 = vld [vmem:[#allocation2 + $0x50] sm:$0xff]  ;;  %v112_v54 = vld [vmem:[#allocation2 + $0x58] sm:$0xff]  ;;  %v113_v55 = vld [vmem:[#allocation2 + $0x60] sm:$0xff] }
  0x50   :  { %1225 = vmatprep.subr.mxu0 %v123_v18  ;;  %344 = vmatpush1.msra.mxu1 %v301_v29  ;;  %v114_v56 = vld [vmem:[#allocation2 + $0x68] sm:$0xff]  ;;  %v115_v57 = vld [vmem:[#allocation2 + $0x70] sm:$0xff]  ;;  %v116_v58 = vld [vmem:[#allocation2 + $0x78] sm:$0xff] }
  0x51   :  { %1226 = vmatpush3.msra.mxu0 %v123_v18  ;;  %345 = vmatprep.subr.mxu1 %v300_v31  ;;  %v289_v59 = vld [vmem:[#allocation7 + $0x20] sm:$0xff]  ;;  %v288_v60 = vld [vmem:[#allocation7 + $0x18] sm:$0xff]  ;;  %v287_v61 = vld [vmem:[#allocation7 + $0x10] sm:$0xff] }
  0x52   :  { %1227 = vmatprep.subr.mxu0 %v122_v21  ;;  %346 = vmatpush1.msra.mxu1 %v299_v32  ;;  %v286_v62 = vld [vmem:[#allocation7 + $0x8] sm:$0xff]  ;;  %v285_v63 = vld [vmem:[#allocation7] sm:$0xff]  ;;  %v505_v1 = vld [vmem:[#allocation8 + $0x78] sm:$0xff] }
  0x53   :  { %1228 = vmatpush3.msra.mxu0 %v122_v21  ;;  %347 = vmatprep.subr.mxu1 %v298_v34  ;;  %v504_v2 = vld [vmem:[#allocation8 + $0x70] sm:$0xff]  ;;  %v503_v3 = vld [vmem:[#allocation8 + $0x68] sm:$0xff]  ;;  %v502_v4 = vld [vmem:[#allocation8 + $0x60] sm:$0xff] }
  0x54   :  { %1229 = vmatprep.subr.mxu0 %v121_v24  ;;  %348 = vmatpush1.msra.mxu1 %v297_v35  ;;  %v501_v5 = vld [vmem:[#allocation8 + $0x58] sm:$0xff]  ;;  %v500_v6 = vld [vmem:[#allocation8 + $0x50] sm:$0xff]  ;;  %v499_v7 = vld [vmem:[#allocation8 + $0x48] sm:$0xff] }
  0x55   :  { %1230 = vmatpush3.msra.mxu0 %v121_v24  ;;  %349 = vmatprep.subr.mxu1 %v296_v37  ;;  %v498_v8 = vld [vmem:[#allocation8 + $0x40] sm:$0xff]  ;;  %v497_v9 = vld [vmem:[#allocation8 + $0x38] sm:$0xff]  ;;  %v496_v10 = vld [vmem:[#allocation8 + $0x30] sm:$0xff] }
  0x56   :  { %1231 = vmatprep.subr.mxu0 %v120_v27  ;;  %350 = vmatpush1.msra.mxu1 %v295_v38  ;;  %v495_v11 = vld [vmem:[#allocation8 + $0x28] sm:$0xff]  ;;  %v494_v12 = vld [vmem:[#allocation8 + $0x20] sm:$0xff]  ;;  %v493_v13 = vld [vmem:[#allocation8 + $0x18] sm:$0xff] }
  0x57   :  { %1232 = vmatpush3.msra.mxu0 %v120_v27  ;;  %351 = vmatprep.subr.mxu1 %v294_v40  ;;  %v1071_v15 = vld [vmem:[%s2004_s2] ss:$0 sm:$0xff] }
  0x58   :  { %1233 = vmatprep.subr.mxu0 %v119_v30  ;;  %352 = vmatpush1.msra.mxu1 %v293_v42 }
  0x59   :  { %1234 = vmatpush3.msra.mxu0 %v119_v30  ;;  %353 = vmatprep.subr.mxu1 %v292_v43 }
  0x5a   :  { %1235 = vmatprep.subr.mxu0 %v118_v33  ;;  %354 = vmatpush1.msra.mxu1 %v291_v44 }
  0x5b   :  { %1236 = vmatpush3.msra.mxu0 %v118_v33  ;;  %355 = vmatprep.subr.mxu1 %v290_v46 }
  0x5c   :  { %1237 = vmatprep.subr.mxu0 %v117_v36  ;;  %356 = vmatpush1.msra.mxu1 %v289_v59 }
  0x5d   :  { %1238 = vmatpush3.msra.mxu0 %v117_v36  ;;  %357 = vmatprep.subr.mxu1 %v288_v60 }
  0x5e   :  { %1240 = vmatmul.mubr.f32.vlgmr.msra.gmra.mxu0 %v102_v39  ;;  %358 = vmatpush1.msra.mxu1 %v287_v61 }
  0x5f   :  { %1242 = vmatprep.mubr.f32.mxu0 %v103_v41  ;;  %359 = vmatprep.subr.mxu1 %v286_v62 }
  0x60   :  { %360 = vmatpush1.msra.mxu1 %v285_v63  ;;  %393 = vmatprep.mubr.f32.mxu1 %v1642_v0 }
  0x61   :  { %1354 = vmatprep.subr.mxu1 %v1642_v0  ;;  %1263 = vmatprep.subr.mxu0 %v505_v1 }
  0x62   :  { %1243 = vmatmul.mubr.f32.gmra.mxu0 %v104_v45 }
  0x63   :  { %1245 = vmatprep.mubr.f32.mxu0 %v105_v47  ;;  %1264 = vmatpush3.msra.mxu0 %v505_v1  ;;  %v492_v47 = vld [vmem:[#allocation8 + $0x10] sm:$0xff] }
  0x64   :  { %1265 = vmatprep.subr.mxu0 %v504_v2 }
  0x65   :  { %1266 = vmatpush3.msra.mxu0 %v504_v2 }
  0x66   :  { %1246 = vmatmul.mubr.f32.gmra.mxu0 %v106_v48  ;;  %1267 = vmatprep.subr.mxu0 %v503_v3  ;;  %v491_v48 = vld [vmem:[#allocation8 + $0x8] sm:$0xff] }
  0x67   :  { %1248 = vmatprep.mubr.f32.mxu0 %v107_v49  ;;  %1268 = vmatpush3.msra.mxu0 %v503_v3  ;;  %v490_v49 = vld [vmem:[#allocation8] sm:$0xff] }
  0x68   :  { %1269 = vmatprep.subr.mxu0 %v502_v4 }
  0x69   :  { %1270 = vmatpush3.msra.mxu0 %v502_v4 }
  0x6a   :  { %1249 = vmatmul.mubr.f32.gmra.mxu0 %v108_v50  ;;  %1271 = vmatprep.subr.mxu0 %v501_v5  ;;  %v319_v50 = vlaneseq }
  0x6b   :  { %1251 = vmatprep.mubr.f32.mxu0 %v109_v51  ;;  %1272 = vmatpush3.msra.mxu0 %v501_v5 }
  0x6c   :  { %1273 = vmatprep.subr.mxu0 %v500_v6  ;;  %v1775_v51 = vshrl.u32 %v319_v50, 7 }
  0x6d   :  { %1274 = vmatpush3.msra.mxu0 %v500_v6 }
  0x6e   :  { %1252 = vmatmul.mubr.f32.gmra.mxu0 %v110_v52  ;;  %1275 = vmatprep.subr.mxu0 %v499_v7  ;;  %v321_v52 = vsub.s32 0, %v1775_v51 }
  0x6f   :  { %1254 = vmatprep.mubr.f32.mxu0 %v111_v53  ;;  %1276 = vmatpush3.msra.mxu0 %v499_v7  ;;  %v1781_v53 = vld [vmem:[%s2006_s4] sm:$0x3] }
  0x70   :  { %1277 = vmatprep.subr.mxu0 %v498_v8 }
  0x71   :  { %1278 = vmatpush3.msra.mxu0 %v498_v8 }
  0x72   :  { %1255 = vmatmul.mubr.f32.gmra.mxu0 %v112_v54  ;;  %1279 = vmatprep.subr.mxu0 %v497_v9  ;;  %v322_v54 = vrot.slane %v1781_v53, %v321_v52 }
  0x73   :  { %1257 = vmatprep.mubr.f32.mxu0 %v113_v55  ;;  %1280 = vmatpush3.msra.mxu0 %v497_v9 }
  0x74   :  { %1281 = vmatprep.subr.mxu0 %v496_v10 }
  0x75   :  { %1282 = vmatpush3.msra.mxu0 %v496_v10 }
  0x76   :  { %1258 = vmatmul.mubr.f32.gmra.mxu0 %v114_v56  ;;  %1283 = vmatprep.subr.mxu0 %v495_v11 }
  0x77   :  { %1260 = vmatprep.mubr.f32.mxu0 %v115_v57  ;;  %1284 = vmatpush3.msra.mxu0 %v495_v11 }
  0x78   :  { %1285 = vmatprep.subr.mxu0 %v494_v12 }
  0x79   :  { %1286 = vmatpush3.msra.mxu0 %v494_v12 }
  0x7a   :  { %1261 = vmatmul.mubr.f32.gmra.mxu0 %v116_v58  ;;  %1287 = vmatprep.subr.mxu0 %v493_v13 }
  0x7b   :  { %1288 = vmatpush3.msra.mxu0 %v493_v13 }
  0x7c   :  { %1289 = vmatprep.subr.mxu0 %v492_v47 }
  0x7d   :  { %1290 = vmatpush3.msra.mxu0 %v492_v47 }
  0x7e   :  { %1291 = vmatprep.subr.mxu0 %v491_v48 }
  0x7f   :  { %1292 = vmatpush3.msra.mxu0 %v491_v48 }
  0x80   :  { %1293 = vmatprep.subr.mxu0 %v490_v49 }
  0x81   :  { %1294 = vmatpush3.msra.mxu0 %v490_v49 }
  0x82   :  { %1319 = vmatprep.subr.mxu0 %v1642_v0 }
 0x11e   :  { %v1241_v14 = vpop.f32.mrf.mxu0 }
 0x11f   :  { %v1731_v20 = vadd.f32 %v1241_v14, %v1071_v15 }
 0x120   :  { %v206_v16 = vpop.f32.mrf.mxu0 }
 0x121   :  { %v1727_v17 = vadd.f32 %v1071_v15, %v206_v16 }
 0x122   :  { %v1244_v18 = vpop.f32.mrf.mxu0 }
 0x123   :  { %394 = vmatmul.mubr.f32.vlgmr.msra.gmra.mxu1 %v1727_v17  ;;  %v1739_v26 = vadd.f32 %v1244_v18, %v1071_v15 }
 0x124   :  { %v216_v19 = vpop.f32.mrf.mxu0  ;;  %399 = vmatprep.mubr.f32.mxu1 %v1642_v0 }
 0x125   :  { %v1735_v23 = vadd.f32 %v1071_v15, %v216_v19 }
 0x126   :  { %v1247_v21 = vpop.f32.mrf.mxu0 }
 0x127   :  { %400 = vmatmul.mubr.f32.gmra.mxu1 %v1731_v20  ;;  %v232_v32 = vadd.f32 %v1247_v21, %v1071_v15 }
 0x128   :  { %v226_v22 = vpop.f32.mrf.mxu0  ;;  %405 = vmatprep.mubr.f32.mxu1 %v1642_v0 }
 0x129   :  { %v227_v29 = vadd.f32 %v1071_v15, %v226_v22 }
 0x12a   :  { %v1250_v24 = vpop.f32.mrf.mxu0 }
 0x12b   :  { %406 = vmatmul.mubr.f32.gmra.mxu1 %v1735_v23  ;;  %v242_v39 = vadd.f32 %v1250_v24, %v1071_v15 }
 0x12c   :  { %v236_v25 = vpop.f32.mrf.mxu0  ;;  %411 = vmatprep.mubr.f32.mxu1 %v1642_v0 }
 0x12d   :  { %v237_v35 = vadd.f32 %v1071_v15, %v236_v25 }
 0x12e   :  { %v1253_v27 = vpop.f32.mrf.mxu0 }
 0x12f   :  { %412 = vmatmul.mubr.f32.gmra.mxu1 %v1739_v26  ;;  %v252_v46 = vadd.f32 %v1253_v27, %v1071_v15 }
 0x130   :  { %v246_v28 = vpop.f32.mrf.mxu0  ;;  %417 = vmatprep.mubr.f32.mxu1 %v1642_v0 }
 0x131   :  { %v247_v43 = vadd.f32 %v1071_v15, %v246_v28 }
 0x132   :  { %v1256_v30 = vpop.f32.mrf.mxu0 }
 0x133   :  { %418 = vmatmul.mubr.f32.gmra.mxu1 %v227_v29  ;;  %v262_v44 = vadd.f32 %v1256_v30, %v1071_v15 }
 0x134   :  { %v256_v31 = vpop.f32.mrf.mxu0  ;;  %423 = vmatprep.mubr.f32.mxu1 %v1642_v0 }
 0x135   :  { %v257_v45 = vadd.f32 %v1071_v15, %v256_v31 }
 0x136   :  { %v1259_v33 = vpop.f32.mrf.mxu0 }
 0x137   :  { %424 = vmatmul.mubr.f32.gmra.mxu1 %v232_v32  ;;  %v272_v41 = vadd.f32 %v1259_v33, %v1071_v15 }
 0x138   :  { %v266_v34 = vpop.f32.mrf.mxu0  ;;  %429 = vmatprep.mubr.f32.mxu1 %v1642_v0 }
 0x139   :  { %v267_v42 = vadd.f32 %v1071_v15, %v266_v34 }
 0x13a   :  { %v1262_v36 = vpop.f32.mrf.mxu0 }
 0x13b   :  { %v282_v37 = vadd.f32 %v1262_v36, %v1071_v15  ;;  %430 = vmatmul.mubr.f32.gmra.mxu1 %v237_v35 }
 0x13c   :  { %v276_v38 = vpop.f32.mrf.mxu0  ;;  %435 = vmatprep.mubr.f32.mxu1 %v1642_v0 }
 0x13d   :  { %v277_v40 = vadd.f32 %v1071_v15, %v276_v38  ;;  %1355 = vmatpush3.msra.mxu1 %v282_v37 }
 0x13e   :  { %1356 = vmatprep.subr.mxu1 %v1642_v0 }
 0x13f   :  { %436 = vmatmul.mubr.f32.gmra.mxu1 %v242_v39 }
 0x140   :  { %1357 = vmatpush3.msra.mxu1 %v277_v40  ;;  %441 = vmatprep.mubr.f32.mxu1 %v1642_v0 }
 0x141   :  { %1358 = vmatprep.subr.mxu1 %v1642_v0 }
 0x142   :  { %1359 = vmatpush3.msra.mxu1 %v272_v41 }
 0x143   :  { %1360 = vmatprep.subr.mxu1 %v1642_v0  ;;  %442 = vmatmul.mubr.f32.gmra.mxu1 %v247_v43 }
 0x144   :  { %1361 = vmatpush3.msra.mxu1 %v267_v42  ;;  %447 = vmatprep.mubr.f32.mxu1 %v1642_v0 }
 0x145   :  { %1362 = vmatprep.subr.mxu1 %v1642_v0 }
 0x146   :  { %1363 = vmatpush3.msra.mxu1 %v262_v44 }
 0x147   :  { %1364 = vmatprep.subr.mxu1 %v1642_v0  ;;  %448 = vmatmul.mubr.f32.gmra.mxu1 %v252_v46 }
 0x148   :  { %1365 = vmatpush3.msra.mxu1 %v257_v45  ;;  %453 = vmatprep.mubr.f32.mxu1 %v1642_v0 }
 0x149   :  { %1366 = vmatprep.subr.mxu1 %v1642_v0 }
 0x14a   :  { %1367 = vmatpush3.msra.mxu1 %v252_v46 }
 0x14b   :  { %1368 = vmatprep.subr.mxu1 %v1642_v0  ;;  %454 = vmatmul.mubr.f32.gmra.mxu1 %v257_v45 }
 0x14c   :  { %1369 = vmatpush3.msra.mxu1 %v247_v43  ;;  %459 = vmatprep.mubr.f32.mxu1 %v1642_v0 }
 0x14d   :  { %1370 = vmatprep.subr.mxu1 %v1642_v0 }
 0x14e   :  { %1371 = vmatpush3.msra.mxu1 %v242_v39  ;;  %v1819_v39 = vld [vmem:[%s2010_s8] sm:$0xff] }
 0x14f   :  { %1372 = vmatprep.subr.mxu1 %v1642_v0  ;;  %460 = vmatmul.mubr.f32.gmra.mxu1 %v262_v44 }
 0x150   :  { %1373 = vmatpush3.msra.mxu1 %v237_v35  ;;  %465 = vmatprep.mubr.f32.mxu1 %v1642_v0 }
 0x151   :  { %1374 = vmatprep.subr.mxu1 %v1642_v0  ;;  %877 = vadd.xlane.f32.xlu0 %v1819_v39 }
 0x152   :  { %1375 = vmatpush3.msra.mxu1 %v232_v32 }
 0x153   :  { %1376 = vmatprep.subr.mxu1 %v1642_v0  ;;  %466 = vmatmul.mubr.f32.gmra.mxu1 %v267_v42 }
 0x154   :  { %1377 = vmatpush3.msra.mxu1 %v227_v29  ;;  %471 = vmatprep.mubr.f32.mxu1 %v1642_v0 }
 0x155   :  { %1378 = vmatprep.subr.mxu1 %v1642_v0 }
 0x156   :  { %1379 = vmatpush3.msra.mxu1 %v1739_v26 }
 0x157   :  { %1380 = vmatprep.subr.mxu1 %v1642_v0  ;;  %472 = vmatmul.mubr.f32.gmra.mxu1 %v272_v41 }
 0x158   :  { %1381 = vmatpush3.msra.mxu1 %v1735_v23  ;;  %477 = vmatprep.mubr.f32.mxu1 %v1642_v0 }
 0x159   :  { %1382 = vmatprep.subr.mxu1 %v1642_v0 }
 0x15a   :  { %1383 = vmatpush3.msra.mxu1 %v1731_v20 }
 0x15b   :  { %1384 = vmatprep.subr.mxu1 %v1642_v0  ;;  %478 = vmatmul.mubr.f32.gmra.mxu1 %v277_v40 }
 0x15c   :  { %1385 = vmatpush3.msra.mxu1 %v1727_v17  ;;  %483 = vmatprep.mubr.f32.mxu1 %v1642_v0 }
 0x15d   :  { %1424 = vmatprep.subr.mxu1 %v1642_v0 }
 0x15f   :  { %484 = vmatmul.mubr.f32.gmra.mxu1 %v282_v37 }
 0x160   :  { %1386 = vmatprep.mubr.msk.f32.mxu1 %vm1643_vm0, %v1642_v0 }
 0x163   :  { %1387 = vmatmul.mubr.f32.vlgmr.msra.gmra.mxu1 %v1819_v39 }
 0x164   :  { %1456 = vmatprep.mubr.msk.f32.mxu1 %vm1643_vm0, %v1642_v0 }
 0x1e3   :  { %v395_v55 = vpop.f32.mrf.mxu1 }
 0x1e4   :  { %v396_v56 = vadd.f32 %v395_v55, %v322_v54 }
 0x1e5   :  { %v1784_v57 = vpop.f32.mrf.mxu1 }
 0x1e6   :  { %1295 = vmatprep.mubr.f32.mxu0 %v396_v56 }
 0x1e7   :  { %v401_v58 = vpop.f32.mrf.mxu1 }
 0x1e8   :  { %v402_v59 = vadd.f32 %v401_v58, %v322_v54 }
 0x1e9   :  { %v1786_v60 = vpop.f32.mrf.mxu1 }
 0x1ea   :  { %1296 = vmatmul.mubr.f32.vlgmr.msra.gmra.mxu0 %v402_v59 }
 0x1eb   :  { %v407_v61 = vpop.f32.mrf.mxu1 }
 0x1ec   :  { %v408_v62 = vadd.f32 %v407_v61, %v322_v54 }
 0x1ed   :  { %v1788_v63 = vpop.f32.mrf.mxu1 }
 0x1ee   :  { %1298 = vmatprep.mubr.f32.mxu0 %v408_v62 }
 0x1ef   :  { %v413_v1 = vpop.f32.mrf.mxu1 }
 0x1f0   :  { %v414_v2 = vadd.f32 %v413_v1, %v322_v54 }
 0x1f1   :  { %v1790_v3 = vpop.f32.mrf.mxu1 }
 0x1f2   :  { %1299 = vmatmul.mubr.f32.gmra.mxu0 %v414_v2 }
 0x1f3   :  { %v419_v4 = vpop.f32.mrf.mxu1 }
 0x1f4   :  { %v420_v5 = vadd.f32 %v419_v4, %v322_v54 }
 0x1f5   :  { %v1792_v6 = vpop.f32.mrf.mxu1 }
 0x1f6   :  { %1301 = vmatprep.mubr.f32.mxu0 %v420_v5 }
 0x1f7   :  { %v425_v7 = vpop.f32.mrf.mxu1 }
 0x1f8   :  { %v426_v8 = vadd.f32 %v425_v7, %v322_v54 }
 0x1f9   :  { %v1794_v9 = vpop.f32.mrf.mxu1 }
 0x1fa   :  { %1302 = vmatmul.mubr.f32.gmra.mxu0 %v426_v8 }
 0x1fb   :  { %v431_v10 = vpop.f32.mrf.mxu1 }
 0x1fc   :  { %v432_v11 = vadd.f32 %v431_v10, %v322_v54 }
 0x1fd   :  { %v1796_v12 = vpop.f32.mrf.mxu1 }
 0x1fe   :  { %1304 = vmatprep.mubr.f32.mxu0 %v432_v11 }
 0x1ff   :  { %v437_v13 = vpop.f32.mrf.mxu1 }
 0x200   :  { %v438_v14 = vadd.f32 %v437_v13, %v322_v54 }
 0x201   :  { %v1798_v15 = vpop.f32.mrf.mxu1 }
 0x202   :  { %1305 = vmatmul.mubr.f32.gmra.mxu0 %v438_v14 }
 0x203   :  { %v443_v16 = vpop.f32.mrf.mxu1 }
 0x204   :  { %v444_v17 = vadd.f32 %v443_v16, %v322_v54 }
 0x205   :  { %v1800_v18 = vpop.f32.mrf.mxu1 }
 0x206   :  { %1307 = vmatprep.mubr.f32.mxu0 %v444_v17 }
 0x207   :  { %v449_v19 = vpop.f32.mrf.mxu1 }
 0x208   :  { %v450_v20 = vadd.f32 %v449_v19, %v322_v54 }
 0x209   :  { %v1802_v21 = vpop.f32.mrf.mxu1 }
 0x20a   :  { %1308 = vmatmul.mubr.f32.gmra.mxu0 %v450_v20 }
 0x20b   :  { %v455_v22 = vpop.f32.mrf.mxu1 }
 0x20c   :  { %v456_v23 = vadd.f32 %v455_v22, %v322_v54 }
 0x20d   :  { %v1804_v24 = vpop.f32.mrf.mxu1 }
 0x20e   :  { %1310 = vmatprep.mubr.f32.mxu0 %v456_v23 }
 0x20f   :  { %v461_v25 = vpop.f32.mrf.mxu1 }
 0x210   :  { %v462_v26 = vadd.f32 %v461_v25, %v322_v54 }
 0x211   :  { %v1806_v27 = vpop.f32.mrf.mxu1 }
 0x212   :  { %1311 = vmatmul.mubr.f32.gmra.mxu0 %v462_v26 }
 0x213   :  { %v467_v28 = vpop.f32.mrf.mxu1 }
 0x214   :  { %v468_v29 = vadd.f32 %v467_v28, %v322_v54 }
 0x215   :  { %v1808_v30 = vpop.f32.mrf.mxu1 }
 0x216   :  { %1313 = vmatprep.mubr.f32.mxu0 %v468_v29 }
 0x217   :  { %v473_v31 = vpop.f32.mrf.mxu1 }
 0x218   :  { %v474_v32 = vadd.f32 %v473_v31, %v322_v54 }
 0x219   :  { %v1810_v33 = vpop.f32.mrf.mxu1 }
 0x21a   :  { %1314 = vmatmul.mubr.f32.gmra.mxu0 %v474_v32 }
 0x21b   :  { %v479_v34 = vpop.f32.mrf.mxu1 }
 0x21c   :  { %v480_v35 = vadd.f32 %v479_v34, %v322_v54 }
 0x21d   :  { %v1812_v36 = vpop.f32.mrf.mxu1 }
 0x21e   :  { %1316 = vmatprep.mubr.f32.mxu0 %v480_v35 }
 0x21f   :  { %v485_v37 = vpop.f32.mrf.mxu1 }
 0x220   :  { %v486_v38 = vadd.f32 %v485_v37, %v322_v54 }
 0x222   :  { %1317 = vmatmul.mubr.f32.gmra.mxu0 %v486_v38 }
 0x223   :  { %1351 = vmatprep.mubr.msk.f32.mxu0 %vm1643_vm0, %v1642_v0 }
 0x2aa   :  { %v1827_v40 = vpop.f32.mrf.mxu0 }
 0x2ac   :  { %v1829_v41 = vpop.f32.mrf.mxu0 }
 0x2b2   :  { %v1831_v42 = vpop.f32.mrf.mxu0 }
 0x2b4   :  { %v1833_v43 = vpop.f32.mrf.mxu0 }
 0x2ba   :  { %v1835_v44 = vpop.f32.mrf.mxu0 }
 0x2bb   :  { %v652_v58 = vmax.f32 %v1827_v40, %v1835_v44 }
 0x2bc   :  { %v1837_v45 = vpop.f32.mrf.mxu0 }
 0x2bd   :  { %v651_v55 = vmax.f32 %v1829_v41, %v1837_v45 }
 0x2c2   :  { %v1306_v46 = vpop.f32.mrf.mxu0 }
 0x2c3   :  { %v654_v59 = vmax.f32 %v1831_v42, %v1306_v46 }
 0x2c4   :  { %v1839_v47 = vpop.f32.mrf.mxu0 }
 0x2c5   :  { %v653_v61 = vmax.f32 %v1833_v43, %v1839_v47 }
 0x2ca   :  { %v1309_v48 = vpop.f32.mrf.mxu0 }
 0x2cb   :  { %v656_v2 = vmax.f32 %v652_v58, %v1309_v48 }
 0x2cc   :  { %v612_v49 = vpop.f32.mrf.mxu0 }
 0x2cd   :  { %v655_v62 = vmax.f32 %v651_v55, %v612_v49 }
 0x2d2   :  { %v1312_v50 = vpop.f32.mrf.mxu0 }
 0x2d3   :  { %v658_v4 = vmax.f32 %v654_v59, %v1312_v50 }
 0x2d4   :  { %v622_v52 = vpop.f32.mrf.mxu0 }
 0x2d5   :  { %v657_v5 = vmax.f32 %v653_v61, %v622_v52 }
 0x2da   :  { %v1315_v54 = vpop.f32.mrf.mxu0 }
 0x2db   :  { %v660_v10 = vmax.f32 %v656_v2, %v1315_v54 }
 0x2dc   :  { %v632_v56 = vpop.f32.mrf.mxu0 }
 0x2dd   :  { %v659_v7 = vmax.f32 %v655_v62, %v632_v56 }
 0x2df   :  { %v663_v14 = vmax.f32 %v659_v7, %v660_v10 }
 0x2e2   :  { %v1318_v1 = vpop.f32.mrf.mxu0 }
 0x2e3   :  { %v662_v11 = vmax.f32 %v658_v4, %v1318_v1 }
 0x2e4   :  { %v642_v8 = vpop.f32.mrf.mxu0 }
 0x2e5   :  { %v661_v13 = vmax.f32 %v657_v5, %v642_v8 }
 0x2e7   :  { %v664_v16 = vmax.f32 %v661_v13, %v662_v11 }
 0x2e9   :  { %v665_v17 = vmax.f32 %v663_v14, %v664_v16 }
 0x2eb   :  { %v666_v19 = vrot.slane %v665_v17, 4 }
 0x2ed   :  { %v667_v20 = vmax.f32 %v665_v17, %v666_v19 }
 0x2ef   :  { %v668_v22 = vrot.slane %v667_v20, 2 }
 0x2f1   :  { %v669_v23 = vmax.f32 %v667_v20, %v668_v22 }
 0x2f3   :  { %v670_v25 = vrot.slane %v669_v23, 1 }
 0x2f5   :  { %v1848_v26 = vmax.f32 %v669_v23, %v670_v25 }
 0x2f7   :  { %v686_v28 = vsub.f32 %v642_v8, %v1848_v26  ;;  %v687_v29 = vsub.f32 %v1318_v1, %v1848_v26  ;;  %v685_v31 = vsub.f32 %v1315_v54, %v1848_v26  ;;  %v684_v32 = vsub.f32 %v632_v56, %v1848_v26 }
 0x2f8   :  { %v683_v38 = vsub.f32 %v1312_v50, %v1848_v26  ;;  %v682_v58 = vsub.f32 %v622_v52, %v1848_v26  ;;  %v681_v61 = vsub.f32 %v1309_v48, %v1848_v26  ;;  %v680_v54 = vsub.f32 %v612_v49, %v1848_v26  ;;  %v487_v52 = vpop.f32.mrf.mxu1 }
 0x2f9   :  { %v716_v34 = vmul.f32 1.442695, %v686_v28  ;;  %v718_v35 = vmul.f32 1.442695, %v687_v29  ;;  %v714_v37 = vmul.f32 1.442695, %v685_v31  ;;  %v679_v2 = vsub.f32 %v1306_v46, %v1848_v26 }
 0x2fa   :  { %v712_v55 = vmul.f32 1.442695, %v684_v32  ;;  %v710_v59 = vmul.f32 1.442695, %v683_v38  ;;  %v708_v62 = vmul.f32 1.442695, %v682_v58  ;;  %v678_v4 = vsub.f32 %v1839_v47, %v1848_v26 }
 0x2fb   :  { %1471 = vpow2.f32 %v716_v34  ;;  %v325_v56 = vsub.s32 1, %v1775_v51  ;;  %v706_v1 = vmul.f32 1.442695, %v681_v61  ;;  %v704_v50 = vmul.f32 1.442695, %v680_v54 }
 0x2fc   :  { %1473 = vpow2.f32 %v718_v35  ;;  %v702_v48 = vmul.f32 1.442695, %v679_v2  ;;  %v677_v49 = vsub.f32 %v1835_v44, %v1848_v26  ;;  %v700_v46 = vmul.f32 1.442695, %v678_v4 }
 0x2fd   :  { %1475 = vpow2.f32 %v714_v37  ;;  %v1863_v5 = vrot.slane %v1781_v53, %v325_v56  ;;  %v676_v8 = vsub.f32 %v1837_v45, %v1848_v26  ;;  %v675_v44 = vsub.f32 %v1831_v42, %v1848_v26 }
 0x2fe   :  { %1477 = vpow2.f32 %v712_v55  ;;  %v698_v11 = vmul.f32 1.442695, %v677_v49  ;;  %v673_v20 = vsub.f32 %v1827_v40, %v1848_v26  ;;  %v672_v25 = vsub.f32 %v1829_v41, %v1848_v26 }
 0x2ff   :  { %1479 = vpow2.f32 %v710_v59  ;;  %v488_v51 = vadd.f32 %v487_v52, %v1863_v5  ;;  %v482_v53 = vadd.f32 %v1812_v36, %v1863_v5  ;;  %v476_v14 = vadd.f32 %v1810_v33, %v1863_v5 }
 0x300   :  { %1481 = vpow2.f32 %v708_v62  ;;  %v696_v16 = vmul.f32 1.442695, %v676_v8  ;;  %v674_v36 = vsub.f32 %v1833_v43, %v1848_v26  ;;  %v470_v19 = vadd.f32 %v1808_v30, %v1863_v5  ;;  %v961_v8 = vld [vmem:[#allocation10 + $0x50] sm:$0xff] }
 0x301   :  { %1483 = vpow2.f32 %v706_v1  ;;  %v694_v33 = vmul.f32 1.442695, %v675_v44  ;;  %v464_v43 = vadd.f32 %v1806_v27, %v1863_v5  ;;  %v458_v40 = vadd.f32 %v1804_v24, %v1863_v5  ;;  %v955_v44 = vld [vmem:[#allocation10 + $0x20] sm:$0xff] }
 0x302   :  { %1485 = vpow2.f32 %v704_v50  ;;  %v692_v23 = vmul.f32 1.442695, %v674_v36  ;;  %v690_v29 = vmul.f32 1.442695, %v673_v20  ;;  %v452_v32 = vadd.f32 %v1802_v21, %v1863_v5  ;;  %v873_v36 = vpop.f32.mrf.mxu1 }
 0x303   :  { %1487 = vpow2.f32 %v702_v48  ;;  %v688_v26 = vmul.f32 1.442695, %v672_v25  ;;  %v446_v24 = vadd.f32 %v1800_v18, %v1863_v5  ;;  %v440_v21 = vadd.f32 %v1798_v15, %v1863_v5  ;;  %v1072_v25 = vld [vmem:[%s2009_s7] ss:$0 sm:$0xff] }
 0x304   :  { %1489 = vpow2.f32 %v700_v46  ;;  %v434_v18 = vadd.f32 %v1796_v12, %v1863_v5  ;;  %v428_v61 = vadd.f32 %v1794_v9, %v1863_v5  ;;  %v422_v54 = vadd.f32 %v1792_v6, %v1863_v5  ;;  %v962_v46 = vld [vmem:[#allocation10 + $0x58] sm:$0xff] }
 0x305   :  { %1491 = vpow2.f32 %v698_v11  ;;  %v416_v1 = vadd.f32 %v1790_v3, %v1863_v5  ;;  %v410_v9 = vadd.f32 %v1788_v63, %v1863_v5  ;;  %v404_v6 = vadd.f32 %v1786_v60, %v1863_v5  ;;  %v965_v60 = vld [vmem:[#allocation10 + $0x70] sm:$0xff]  ;;  %v956_v11 = vld [vmem:[#allocation10 + $0x28] sm:$0xff] }
 0x306   :  { %1493 = vpow2.f32 %v696_v16  ;;  %v398_v3 = vadd.f32 %v1784_v57, %v1863_v5  ;;  %v966_v57 = vld [vmem:[#allocation10 + $0x78] sm:$0xff]  ;;  %v964_v5 = vld [vmem:[#allocation10 + $0x68] sm:$0xff]  ;;  %v951_v16 = vld [vmem:[#allocation10] sm:$0xff] }
 0x307   :  { %1495 = vpow2.f32 %v694_v33  ;;  %1425 = vmatpush3.msra.mxu1 %v966_v57 }
 0x308   :  { %v1867_v7 = vpop.eup %1471  ;;  %1497 = vpow2.f32 %v692_v23  ;;  %1426 = vmatprep.subr.mxu1 %v1642_v0  ;;  %v878_v23 = vpop.xlane.xlu0 %877 }
 0x309   :  { %v1872_v10 = vpop.eup %1473  ;;  %v735_v45 = vmul.f32 %v1867_v7, %v482_v53  ;;  %1499 = vpow2.f32 %v690_v29  ;;  %1427 = vmatpush3.msra.mxu1 %v965_v60  ;;  %v958_v53 = vld [vmem:[#allocation10 + $0x38] sm:$0xff]  ;;  %vm1044_vm1 = vcmp.eq.f32.partialorder %v878_v23, 1.0  ;;  %vm1047_vm2 = vcmp.gt.f32.partialorder %v878_v23, 1.0 }
 0x30a   :  { %v736_v47 = vmul.f32 %v1872_v10, %v488_v51  ;;  %v1879_v13 = vpop.eup %1475  ;;  %1501 = vpow2.f32 %v688_v26  ;;  %1428 = vmatprep.subr.mxu1 %v1642_v0 }
 0x30b   :  { %v1886_v17 = vpop.eup %1477  ;;  %v734_v42 = vmul.f32 %v1879_v13, %v476_v14  ;;  %1429 = vmatpush3.msra.mxu1 %v964_v5  ;;  %v953_v14 = vld [vmem:[#allocation10 + $0x10] sm:$0xff] }
 0x30c   :  { %1320 = vmatpush3.msra.mxu0 %v736_v47  ;;  %v1894_v22 = vpop.eup %1479  ;;  %v733_v30 = vmul.f32 %v1886_v17, %v470_v19  ;;  %1430 = vmatprep.subr.mxu1 %v1642_v0  ;;  %v957_v47 = vld [vmem:[#allocation10 + $0x30] sm:$0xff] }
 0x30d   :  { %1321 = vmatprep.subr.mxu0 %v1642_v0  ;;  %v1902_v28 = vpop.eup %1481  ;;  %v732_v27 = vmul.f32 %v1894_v22, %v464_v43 }
 0x30e   :  { %1322 = vmatpush3.msra.mxu0 %v735_v45  ;;  %v1908_v31 = vpop.eup %1483  ;;  %v731_v41 = vmul.f32 %v1902_v28, %v458_v40  ;;  %v952_v45 = vld [vmem:[#allocation10 + $0x8] sm:$0xff]  ;;  %v1074_v40 = vsel %vm1047_vm2, 1.0, %v1642_v0 }
 0x30f   :  { %1323 = vmatprep.subr.mxu0 %v1642_v0  ;;  %v1914_v34 = vpop.eup %1485  ;;  %v730_v35 = vmul.f32 %v1908_v31, %v452_v32 }
 0x310   :  { %1324 = vmatpush3.msra.mxu0 %v734_v42  ;;  %v1920_v37 = vpop.eup %1487  ;;  %v729_v38 = vmul.f32 %v1914_v34, %v446_v24 }
 0x311   :  { %1325 = vmatprep.subr.mxu0 %v1642_v0  ;;  %v1490_v55 = vpop.eup %1489  ;;  %v728_v58 = vmul.f32 %v1920_v37, %v440_v21 }
 0x312   :  { %1326 = vmatpush3.msra.mxu0 %v733_v30  ;;  %v1492_v59 = vpop.eup %1491  ;;  %v727_v15 = vmul.f32 %v1490_v55, %v434_v18 }
 0x313   :  { %1327 = vmatprep.subr.mxu0 %v1642_v0  ;;  %v1494_v62 = vpop.eup %1493  ;;  %v726_v56 = vmul.f32 %v1492_v59, %v428_v61 }
 0x314   :  { %1328 = vmatpush3.msra.mxu0 %v732_v27  ;;  %v1496_v12 = vpop.eup %1495  ;;  %v725_v2 = vmul.f32 %v1494_v62, %v422_v54 }
 0x315   :  { %1329 = vmatprep.subr.mxu0 %v1642_v0  ;;  %v1498_v50 = vpop.eup %1497  ;;  %v724_v4 = vmul.f32 %v1496_v12, %v416_v1 }
 0x316   :  { %1330 = vmatpush3.msra.mxu0 %v731_v41  ;;  %v1500_v52 = vpop.eup %1499  ;;  %v723_v48 = vmul.f32 %v1498_v50, %v410_v9 }
 0x317   :  { %1331 = vmatprep.subr.mxu0 %v1642_v0  ;;  %v1502_v49 = vpop.eup %1501  ;;  %v722_v51 = vmul.f32 %v1500_v52, %v404_v6 }
 0x318   :  { %1332 = vmatpush3.msra.mxu0 %v730_v35  ;;  %v721_v63 = vmul.f32 %v1502_v49, %v398_v3 }
 0x319   :  { %1333 = vmatprep.subr.mxu0 %v1642_v0 }
 0x31a   :  { %1334 = vmatpush3.msra.mxu0 %v729_v38 }
 0x31b   :  { %1335 = vmatprep.subr.mxu0 %v1642_v0 }
 0x31c   :  { %1336 = vmatpush3.msra.mxu0 %v728_v58 }
 0x31d   :  { %1337 = vmatprep.subr.mxu0 %v1642_v0 }
 0x31e   :  { %1338 = vmatpush3.msra.mxu0 %v727_v15 }
 0x31f   :  { %1339 = vmatprep.subr.mxu0 %v1642_v0 }
 0x320   :  { %1340 = vmatpush3.msra.mxu0 %v726_v56 }
 0x321   :  { %1341 = vmatprep.subr.mxu0 %v1642_v0 }
 0x322   :  { %1342 = vmatpush3.msra.mxu0 %v725_v2 }
 0x323   :  { %1343 = vmatprep.subr.mxu0 %v1642_v0 }
 0x324   :  { %1344 = vmatpush3.msra.mxu0 %v724_v4 }
 0x325   :  { %1345 = vmatprep.subr.mxu0 %v1642_v0 }
 0x326   :  { %1346 = vmatpush3.msra.mxu0 %v723_v48 }
 0x327   :  { %1347 = vmatprep.subr.mxu0 %v1642_v0 }
 0x328   :  { %1348 = vmatpush3.msra.mxu0 %v722_v51 }
 0x329   :  { %1349 = vmatprep.subr.mxu0 %v1642_v0 }
 0x32a   :  { %1350 = vmatpush3.msra.mxu0 %v721_v63 }
 0x32b   :  { %1352 = vmatmul.mubr.f32.vlgmr.msra.gmra.mxu0 %v1819_v39  ;;  %1389 = vmatprep.subr.mxu0 %v1642_v0 }
 0x32c   :  { %1390 = vmatpush3.msra.mxu0 %v1872_v10  ;;  %1421 = vmatprep.mubr.msk.f32.mxu0 %vm1643_vm0, %v1642_v0  ;;  %v959_v10 = vld [vmem:[#allocation10 + $0x40] sm:$0xff] }
 0x32d   :  { %1391 = vmatprep.subr.mxu0 %v1642_v0 }
 0x32e   :  { %1392 = vmatpush3.msra.mxu0 %v1867_v7  ;;  %v963_v7 = vld [vmem:[#allocation10 + $0x60] sm:$0xff] }
 0x32f   :  { %1393 = vmatprep.subr.mxu0 %v1642_v0  ;;  %1431 = vmatpush3.msra.mxu1 %v963_v7 }
 0x330   :  { %1394 = vmatpush3.msra.mxu0 %v1879_v13  ;;  %1432 = vmatprep.subr.mxu1 %v1642_v0  ;;  %v954_v13 = vld [vmem:[#allocation10 + $0x18] sm:$0xff] }
 0x331   :  { %1395 = vmatprep.subr.mxu0 %v1642_v0  ;;  %1433 = vmatpush3.msra.mxu1 %v962_v46 }
 0x332   :  { %1396 = vmatpush3.msra.mxu0 %v1886_v17  ;;  %1434 = vmatprep.subr.mxu1 %v1642_v0  ;;  %v1388_v17 = vpop.f32.mrf.mxu1 }
 0x333   :  { %1397 = vmatprep.subr.mxu0 %v1642_v0  ;;  %1435 = vmatpush3.msra.mxu1 %v961_v8 }
 0x334   :  { %1398 = vmatpush3.msra.mxu0 %v1894_v22  ;;  %1436 = vmatprep.subr.mxu1 %v1642_v0 }
 0x335   :  { %1399 = vmatprep.subr.mxu0 %v1642_v0 }
 0x336   :  { %1400 = vmatpush3.msra.mxu0 %v1902_v28  ;;  %v1073_v28 = vsel %vm1044_vm1, 1.0, %v1642_v0 }
 0x337   :  { %1401 = vmatprep.subr.mxu0 %v1642_v0  ;;  %v1050_v32 = vmul.f32 %v1073_v28, %v873_v36 }
 0x338   :  { %1402 = vmatpush3.msra.mxu0 %v1908_v31 }
 0x339   :  { %1403 = vmatprep.subr.mxu0 %v1642_v0 }
 0x33a   :  { %1404 = vmatpush3.msra.mxu0 %v1914_v34 }
 0x33b   :  { %1405 = vmatprep.subr.mxu0 %v1642_v0 }
 0x33c   :  { %1406 = vmatpush3.msra.mxu0 %v1920_v37 }
 0x33d   :  { %1407 = vmatprep.subr.mxu0 %v1642_v0 }
 0x33e   :  { %1408 = vmatpush3.msra.mxu0 %v1490_v55 }
 0x33f   :  { %1409 = vmatprep.subr.mxu0 %v1642_v0 }
 0x340   :  { %1410 = vmatpush3.msra.mxu0 %v1492_v59 }
 0x341   :  { %1411 = vmatprep.subr.mxu0 %v1642_v0 }
 0x342   :  { %1412 = vmatpush3.msra.mxu0 %v1494_v62 }
 0x343   :  { %1413 = vmatprep.subr.mxu0 %v1642_v0 }
 0x344   :  { %1414 = vmatpush3.msra.mxu0 %v1496_v12 }
 0x345   :  { %1415 = vmatprep.subr.mxu0 %v1642_v0 }
 0x346   :  { %1416 = vmatpush3.msra.mxu0 %v1498_v50 }
 0x347   :  { %1417 = vmatprep.subr.mxu0 %v1642_v0 }
 0x348   :  { %1418 = vmatpush3.msra.mxu0 %v1500_v52 }
 0x349   :  { %1419 = vmatprep.subr.mxu0 %v1642_v0 }
 0x34a   :  { %1420 = vmatpush3.msra.mxu0 %v1502_v49 }
 0x34b   :  { %1422 = vmatmul.mubr.f32.vlgmr.msra.gmra.mxu0 %v1819_v39  ;;  %v960_v39 = vld [vmem:[#allocation10 + $0x48] sm:$0xff] }
 0x34c   :  { %1437 = vmatpush3.msra.mxu1 %v960_v39 }
 0x34d   :  { %1438 = vmatprep.subr.mxu1 %v1642_v0 }
 0x34e   :  { %1439 = vmatpush3.msra.mxu1 %v959_v10 }
 0x34f   :  { %1440 = vmatprep.subr.mxu1 %v1642_v0 }
 0x350   :  { %1441 = vmatpush3.msra.mxu1 %v958_v53 }
 0x351   :  { %1442 = vmatprep.subr.mxu1 %v1642_v0 }
 0x352   :  { %1443 = vmatpush3.msra.mxu1 %v957_v47 }
 0x353   :  { %1444 = vmatprep.subr.mxu1 %v1642_v0 }
 0x354   :  { %1445 = vmatpush3.msra.mxu1 %v956_v11 }
 0x355   :  { %1446 = vmatprep.subr.mxu1 %v1642_v0 }
 0x356   :  { %1447 = vmatpush3.msra.mxu1 %v955_v44 }
 0x357   :  { %1448 = vmatprep.subr.mxu1 %v1642_v0 }
 0x358   :  { %1449 = vmatpush3.msra.mxu1 %v954_v13 }
 0x359   :  { %1450 = vmatprep.subr.mxu1 %v1642_v0 }
 0x35a   :  { %1451 = vmatpush3.msra.mxu1 %v953_v14 }
 0x35b   :  { %1452 = vmatprep.subr.mxu1 %v1642_v0 }
 0x35c   :  { %1453 = vmatpush3.msra.mxu1 %v952_v45 }
 0x35d   :  { %1454 = vmatprep.subr.mxu1 %v1642_v0 }
 0x35e   :  { %1455 = vmatpush3.msra.mxu1 %v951_v16 }
 0x3eb   :  { %v803_v19 = vpop.f32.mrf.mxu0 }
 0x3ed   :  { %v1353_v42 = vpop.f32.mrf.mxu0 }
 0x40b   :  { %v945_v33 = vpop.f32.mrf.mxu0 }
 0x40c   :  { %v946_v20 = vadd.f32 1e-30, %v945_v33 }
 0x40d   :  { %v1423_v22 = vpop.f32.mrf.mxu0 }
 0x40e   :  { %1503 = vrcp.f32 %v946_v20 }
 0x41b   :  { %v1504_v43 = vpop.eup %1503 }
 0x41c   :  { %v950_v30 = vmul.f32 %v1504_v43, %v803_v19 }
 0x41e   :  { %1457 = vmatmul.mubr.f32.vlgmr.msra.gmra.mxu1 %v950_v30 }
 0x4de   :  { %v1040_v27 = vpop.f32.mrf.mxu1 }
 0x4df   :  { %v1041_v29 = vadd.f32 %v1072_v25, %v1040_v27 }
 0x4e0   :  { %v1458_v31 = vpop.f32.mrf.mxu1 }
 0x4e1   :  { %v1051_v41 = vmul.f32 %v1074_v40, %v1041_v29 }
 0x4e3   :  { %v1052_v26 = vadd.f32 %v1051_v41, %v1050_v32 }
 0x4e5   :  { %1053 = vst [vmem:[#allocation11] sm:$0xff] %v1052_v26 }
 0x4e6   :  { %1616 = shalt.err (!%p1613_p1)
}
 0x4e7   :  { %1063 = dma.vmem_to_hbm [thread:$0]  %s1061_s18, 128, %s2011_s9, [#allocation4]  }
 0x4e8   :  { %1631 = dma.done.wait [#allocation4], 128  }
 0x4e9   :  { %1632 = vsyncadd [#allocation4], 4294967168 }
 0x4ea   :  { %1067 = vsyncpa [#allocation3], 1 }
 0x4eb   :  { %1068 = vsyncpa [#allocation6], 1 }
 0x4ec   :  { %1069 = vsyncpa [#allocation9], 1 }
 0x4ed   :  { %1070 = vsyncpa [#allocation4], 1 }

</bundles_post_ra>
